<compile_context>
chip_gen: v7x
topology: tpu7x:2x2x1
jax: 0.10.0
libtpu: 0.0.40
codegen_flags: <defaults>
</compile_context>

<pallas_src>
import functools

import jax
import jax.numpy as jnp
from jax.experimental import pallas as pl
from jax.experimental.pallas import tpu as pltpu

_LANE = 128     # last-dim tiling unit (vreg lanes)
_SUBLANE = 8    # second-to-last-dim tiling unit (vreg sublanes)


def _cdiv(a, b):
    return -(-a // b)


def _round_up(n, m):
    return _cdiv(n, m) * m


@functools.lru_cache(maxsize=None)
def _vmem_budget_bytes():
    """Generation-aware VMEM budget (bytes) with headroom for compiler scratch."""
    try:
        cap = int(pltpu.get_tpu_info().vmem_capacity_bytes)
    except Exception:
        cap = 64 * 1024 * 1024   # conservative fallback: v7x per-TensorCore VMEM
    return max(cap * 3 // 4, 32 * 1024 * 1024)


def mlp_kernel(x_ref, w1_ref, b1_ref, w2_ref, b2_ref, o_ref):
    """One batch tile: out = ReLU(x @ w1 + b1) @ w2 + b2 (dropout = identity)."""
    # Cast x to the matmul compute dtype in-kernel (no wrapper-side HBM pass).
    x = x_ref[...].astype(w1_ref.dtype)
    # Layer 1: MXU matmul with f32 accumulation; bias add + ReLU in f32 (VPU).
    h = jnp.dot(x, w1_ref[...], preferred_element_type=jnp.float32)
    h = jnp.maximum(h + b1_ref[...], 0.0)
    # Dropout(p=0.3): identity in eval mode.
    # TODO(synk): training-mode dropout (pltpu.prng_seed + prng_random_bits
    #             Bernoulli mask scaled by 1/(1-p)) omitted for eval parity.
    # Layer 2: only the matmul LHS is downcast to the weight compute dtype.
    y = jnp.dot(h.astype(w2_ref.dtype), w2_ref[...],
                preferred_element_type=jnp.float32)
    o_ref[...] = (y + b2_ref[...]).astype(o_ref.dtype)


def prepare_params(w1, b1, w2, b2, compute_dtype=jnp.bfloat16):
    """One-time weight prep (model-load time, NOT per forward call).

    Pads hidden/output feature dims to lane multiples (a mathematical no-op:
    padded rows/columns are zero) and casts weights to the MXU compute dtype.
    Weights are stored [in, out] (transposed vs PyTorch's [out, in]).
    """
    D_in, H = w1.shape
    D_out = w2.shape[1]
    Hp = _round_up(H, _LANE)
    Np = _round_up(D_out, _LANE)
    cdt = jnp.dtype(compute_dtype)
    w1p = jnp.zeros((D_in, Hp), cdt).at[:, :H].set(w1.astype(cdt))
    b1p = jnp.zeros((1, Hp), jnp.float32).at[:, :H].set(
        b1.reshape(1, -1).astype(jnp.float32))
    w2p = jnp.zeros((Hp, Np), cdt).at[:H, :D_out].set(w2.astype(cdt))
    b2p = jnp.zeros((1, Np), jnp.float32).at[:, :D_out].set(
        b2.reshape(1, -1).astype(jnp.float32))
    return w1p, b1p, w2p, b2p


@functools.partial(jax.jit, static_argnames=("d_out", "block_b"))
def mlp_forward(x, w1p, b1p, w2p, b2p, *, d_out, block_b=1024):
    """x: [B, D_in] (original dtype); w1p/b1p/w2p/b2p from prepare_params()."""
    B, D_in = x.shape
    Hp = w1p.shape[1]
    Np = w2p.shape[1]
    cdt = jnp.dtype(w1p.dtype)
    x_itemsize = jnp.dtype(x.dtype).itemsize
    # bf16 compute -> bf16 padded writeback (half the HBM bytes); f32 stays f32.
    out_dtype = jnp.float32 if cdt == jnp.dtype(jnp.float32) else cdt
    out_itemsize = jnp.dtype(out_dtype).itemsize

    # ---- Batch tiling -----------------------------------------------------
    # Tight TB: n_tiles tiles of ~B/n_tiles rows (sublane-rounded) keeps batch
    # padding waste small; force >= 2 grid steps (when B allows) so the
    # "parallel" axis can shard across v7x's two TensorCores.
    n_tiles = max(1, _cdiv(B, block_b))
    if n_tiles < 2 and B >= 2 * _SUBLANE:
        n_tiles = 2
    TB = _round_up(_cdiv(B, n_tiles), _SUBLANE)

    # ---- Generation-aware VMEM footprint check -----------------------------
    budget = _vmem_budget_bytes()
    # Weights/biases use constant index_maps (fetched once, revisited every
    # step); the default pipeline still allocates two buffers, so budget 2x.
    # TODO(synk): single-buffer them via pipeline_mode=pl.Buffered(1) once
    #             verified on all target generations.
    weight_bytes = 2 * ((D_in * Hp + Hp * Np) * cdt.itemsize + (Hp + Np) * 4)

    def tile_bytes(tb):
        return (2 * tb * D_in * x_itemsize        # x tiles (double-buffered)
                + 2 * tb * Np * out_itemsize      # out tiles (double-buffered)
                + tb * D_in * cdt.itemsize        # in-kernel cast copy of x
                + tb * Hp * (4 + cdt.itemsize)    # f32 hidden + downcast copy
                + tb * Np * 4)                    # f32 y before the store cast

    while TB > _SUBLANE and weight_bytes + tile_bytes(TB) > budget:
        TB = max(_SUBLANE, _round_up(TB // 2, _SUBLANE))
    # TODO(synk): if resident weights alone outgrow the budget (v7x first),
    #             add a hidden-dim grid axis with an f32 accumulator scratch
    #             and pl.when init/finalize instead of relying on headroom.

    Bp = _round_up(B, TB)
    grid = (Bp // TB,)

    # Minimal batch pad (only when B is not a tile multiple); feature dims are
    # NOT padded in HBM — padded rows are zero and sliced off below.
    x_in = x if Bp == B else jnp.pad(x, ((0, Bp - B), (0, 0)))

    out_padded = pl.pallas_call(
        mlp_kernel,
        out_shape=jax.ShapeDtypeStruct((Bp, Np), out_dtype),
        grid=grid,
        in_specs=[
            pl.BlockSpec((TB, D_in), lambda i: (i, 0)),   # x: tiled over batch
            pl.BlockSpec((D_in, Hp), lambda i: (0, 0)),   # w1: VMEM-resident
            pl.BlockSpec((1, Hp), lambda i: (0, 0)),      # b1: VMEM-resident
            pl.BlockSpec((Hp, Np), lambda i: (0, 0)),     # w2: VMEM-resident
            pl.BlockSpec((1, Np), lambda i: (0, 0)),      # b2: VMEM-resident
        ],
        out_specs=pl.BlockSpec((TB, Np), lambda i: (i, 0)),
        compiler_params=pltpu.CompilerParams(
            dimension_semantics=("parallel",),   # batch tiles are independent
            vmem_limit_bytes=int(budget),
        ),
    )(x_in, w1p, b1p, w2p, b2p)

    # Slice off padding; tiny (B, d_out) result upcast back to the input dtype.
    return out_padded[:B, :d_out].astype(x.dtype)


def init_params(key, input_dim, hidden_dim, output_dim, dtype=jnp.float32):
    """Deterministic init mimicking PyTorch nn.Linear default
    (uniform(-1/sqrt(fan_in), +1/sqrt(fan_in))); stored as [in, out]."""
    k1, k2, k3, k4 = jax.random.split(key, 4)
    lim1 = 1.0 / (input_dim ** 0.5)
    lim2 = 1.0 / (hidden_dim ** 0.5)
    w1 = jax.random.uniform(k1, (input_dim, hidden_dim), dtype, -lim1, lim1)
    b1 = jax.random.uniform(k2, (1, hidden_dim), dtype, -lim1, lim1)
    w2 = jax.random.uniform(k3, (hidden_dim, output_dim), dtype, -lim2, lim2)
    b2 = jax.random.uniform(k4, (1, output_dim), dtype, -lim2, lim2)
    return w1, b1, w2, b2


def reference_forward(x, w1, b1, w2, b2):
    h = jnp.maximum(x @ w1 + b1, 0.0)
    return h @ w2 + b2


if __name__ == "__main__":
    # Small shapes consistent with the module: input_dim=16, hidden_dim=32,
    # output_dim=8. batch=37 (not a tile multiple) so batch padding and the
    # multi-tile grid path are exercised.
    B, D_in, H, D_out = 37, 16, 32, 8

    key = jax.random.PRNGKey(0)
    kx, kp = jax.random.split(key)
    x = jax.random.normal(kx, (B, D_in), dtype=jnp.float32)
    w1, b1, w2, b2 = init_params(kp, D_in, H, D_out)

    ref = reference_forward(x, w1, b1, w2, b2)

    # f32 compute path (test-only): strict check vs the f32 reference.
    p_f32 = prepare_params(w1, b1, w2, b2, compute_dtype=jnp.float32)
    out_f32 = jax.block_until_ready(
        mlp_forward(x, *p_f32, d_out=D_out, block_b=16))
    assert out_f32.shape == (B, D_out), out_f32.shape
    assert jnp.allclose(out_f32, ref, atol=1e-5, rtol=1e-5), \
        "f32 mismatch vs reference"

    # bf16 MXU path (production default): looser tolerance (bf16 in/out).
    p_bf16 = prepare_params(w1, b1, w2, b2)   # bf16 weights, prepared once
    out_bf16 = jax.block_until_ready(
        mlp_forward(x, *p_bf16, d_out=D_out, block_b=16))
    assert out_bf16.shape == (B, D_out), out_bf16.shape
    assert jnp.allclose(out_bf16, ref, atol=5e-2, rtol=5e-2), \
        "bf16 mismatch vs reference"

    # Default block_b path: exercises the ">= 2 grid steps" megacore branch.
    out_def = jax.block_until_ready(mlp_forward(x, *p_bf16, d_out=D_out))
    assert out_def.shape == (B, D_out), out_def.shape
    assert jnp.allclose(out_def, ref, atol=5e-2, rtol=5e-2), \
        "default-tile mismatch vs reference"

    print("KERNEL_OK")
</pallas_src>

<mosaic_0001>
module attributes {stable_mosaic.version = 11 : i64} {
  func.func @mlp_kernel(%arg0: i32, %arg1: memref<16x16xf32, #tpu.memory_space<vmem>>, %arg2: memref<16x128xf32, #tpu.memory_space<vmem>>, %arg3: memref<1x128xf32, #tpu.memory_space<vmem>>, %arg4: memref<128x128xf32, #tpu.memory_space<vmem>>, %arg5: memref<1x128xf32, #tpu.memory_space<vmem>>, %arg6: memref<16x128xf32, #tpu.memory_space<vmem>>) attributes {dimension_semantics = [#tpu.dimension_semantics<parallel>], iteration_bounds = array<i64: 3>, scalar_prefetch = 0 : i64, scratch_operands = 0 : i64, tpu.core_type = #tpu.core_type<tc>, window_params = [{transform_indices = @transform_0, window_bounds = array<i64: 16, 16>}, {pipeline_mode = #tpu.pipeline_mode<synchronous>, transform_indices = @transform_1, window_bounds = array<i64: 16, 128>}, {pipeline_mode = #tpu.pipeline_mode<synchronous>, transform_indices = @transform_2, window_bounds = array<i64: 1, 128>}, {pipeline_mode = #tpu.pipeline_mode<synchronous>, transform_indices = @transform_3, window_bounds = array<i64: 128, 128>}, {pipeline_mode = #tpu.pipeline_mode<synchronous>, transform_indices = @transform_4, window_bounds = array<i64: 1, 128>}, {transform_indices = @transform_5, window_bounds = array<i64: 16, 128>}]} {
    %c0 = arith.constant 0 : index
    %c0_0 = arith.constant 0 : index
    %0 = vector.load %arg1[%c0, %c0_0] : memref<16x16xf32, #tpu.memory_space<vmem>>, vector<16x16xf32>
    %c0_1 = arith.constant 0 : index
    %c0_2 = arith.constant 0 : index
    %1 = vector.load %arg2[%c0_1, %c0_2] : memref<16x128xf32, #tpu.memory_space<vmem>>, vector<16x128xf32>
    %cst = arith.constant dense<0.000000e+00> : vector<16x128xf32>
    %2 = tpu.matmul %0, %1, %cst {dimension_numbers = #tpu.dot_dimension_numbers<[1], [0], [0], [1], [0, 0, 1, 1], [], []>} : vector<16x16xf32>, vector<16x128xf32>, vector<16x128xf32> -> vector<16x128xf32>
    %c0_3 = arith.constant 0 : index
    %c0_4 = arith.constant 0 : index
    %3 = vector.load %arg3[%c0_3, %c0_4] : memref<1x128xf32, #tpu.memory_space<vmem>>, vector<1x128xf32>
    %4 = vector.broadcast %3 : vector<1x128xf32> to vector<16x128xf32>
    %5 = arith.addf %2, %4 : vector<16x128xf32>
    %cst_5 = arith.constant 0.000000e+00 : f32
    %6 = vector.broadcast %cst_5 : f32 to vector<16x128xf32>
    %7 = arith.maximumf %5, %6 : vector<16x128xf32>
    %c0_6 = arith.constant 0 : index
    %c0_7 = arith.constant 0 : index
    %8 = vector.load %arg4[%c0_6, %c0_7] : memref<128x128xf32, #tpu.memory_space<vmem>>, vector<128x128xf32>
    %cst_8 = arith.constant dense<0.000000e+00> : vector<16x128xf32>
    %9 = tpu.matmul %7, %8, %cst_8 {dimension_numbers = #tpu.dot_dimension_numbers<[1], [0], [0], [1], [0, 0, 1, 1], [], []>} : vector<16x128xf32>, vector<128x128xf32>, vector<16x128xf32> -> vector<16x128xf32>
    %c0_9 = arith.constant 0 : index
    %c0_10 = arith.constant 0 : index
    %10 = vector.load %arg5[%c0_9, %c0_10] : memref<1x128xf32, #tpu.memory_space<vmem>>, vector<1x128xf32>
    %11 = vector.broadcast %10 : vector<1x128xf32> to vector<16x128xf32>
    %12 = arith.addf %9, %11 : vector<16x128xf32>
    %c0_11 = arith.constant 0 : index
    %c0_12 = arith.constant 0 : index
    %13 = vector.load %arg6[%c0_11, %c0_12] : memref<16x128xf32, #tpu.memory_space<vmem>>, vector<16x128xf32>
    tpu.vector_store %arg6[%c0_11, %c0_12], %12 {strides = array<i32>} : memref<16x128xf32, #tpu.memory_space<vmem>>, vector<16x128xf32>,
    return
  }
  func.func @transform_0(%arg0: i32) -> (i32, i32) {
    %c0_i32 = arith.constant 0 : i32
    %c0_i32_0 = arith.constant 0 : i32
    return %arg0, %c0_i32 : i32, i32
  }
  func.func @transform_1(%arg0: i32) -> (i32, i32) {
    %c0_i32 = arith.constant 0 : i32
    %c0_i32_0 = arith.constant 0 : i32
    %c0_i32_1 = arith.constant 0 : i32
    return %c0_i32, %c0_i32_0 : i32, i32
  }
  func.func @transform_2(%arg0: i32) -> (i32, i32) {
    %c0_i32 = arith.constant 0 : i32
    %c0_i32_0 = arith.constant 0 : i32
    %c0_i32_1 = arith.constant 0 : i32
    return %c0_i32, %c0_i32_0 : i32, i32
  }
  func.func @transform_3(%arg0: i32) -> (i32, i32) {
    %c0_i32 = arith.constant 0 : i32
    %c0_i32_0 = arith.constant 0 : i32
    %c0_i32_1 = arith.constant 0 : i32
    return %c0_i32, %c0_i32_0 : i32, i32
  }
  func.func @transform_4(%arg0: i32) -> (i32, i32) {
    %c0_i32 = arith.constant 0 : i32
    %c0_i32_0 = arith.constant 0 : i32
    %c0_i32_1 = arith.constant 0 : i32
    return %c0_i32, %c0_i32_0 : i32, i32
  }
  func.func @transform_5(%arg0: i32) -> (i32, i32) {
    %c0_i32 = arith.constant 0 : i32
    %c0_i32_0 = arith.constant 0 : i32
    return %arg0, %c0_i32 : i32, i32
  }
}

</mosaic_0001>

<bundles_post_ra>
// kernel: mlp_forward.1
= control target key start
LH: loop header
LB: loop body
LE: loop exit
PB: predicated region body
PF: predicated region fallthrough
CT: control target
= control target key end

     0   :  { %s640_s18 = smov 0   ;;  %s724_s0 = inlined_call_operand.vmem [shape: f32[48,16], index: 0, kind: input, shape index: {}]   ;;  %s725_s1 = inlined_call_operand.vmem [shape: f32[16,128], index: 1, kind: input, shape index: {}]   ;;  %s726_s2 = inlined_call_operand.vmem [shape: f32[1,128], index: 2, kind: input, shape index: {}]   ;;  %s727_s3 = inlined_call_operand.vmem [shape: f32[128,128], index: 3, kind: input, shape index: {}]   ;;  %s728_s4 = inlined_call_operand.vmem [shape: f32[1,128], index: 4, kind: input, shape index: {}]   ;;  %s729_s5 = inlined_call_operand.vmem [shape: f32[48,128], index: 5, kind: output, shape index: {}]  }
   0x1 LB: > { %s479_s19 = sadd.s32 4294967295, %s608_s18   ;;  %p483_p0 = scmp.ge.s32.totalorder %s608_s18, 1  ;;  %s608_s18 = sphi %s640_s18, %s15_s18  }
   0x2   : > { %p188_p1 = scmp.lt.s32.totalorder %s608_s18, 4 }
   0x4   : > { %p189_p2 = pnand %p483_p0, %p188_p1 }
   0x5   : > { %v230_v0 = vld [vmem:[%s725_s1] sm:$0xff] (!%p189_p2)  ;;  %v231_v1 = vld [vmem:[%s725_s1 + $0x8] sm:$0xff] (!%p189_p2)  ;;  %s484_s24 = sshll.u32 (!%p189_p2), %s479_s19, 1  ;;  %v325_v5 = vld [vmem:[%s727_s3 + $0x10] sm:$0xff] (!%p189_p2)  ;;  %vm239_vm0 = vcmask (!%p189_p2), 130048  }
   0x6   : > { %192 = sbr.rel (%p189_p2) target bundleno = 452 (0x1c4), region = 40  ;;  %v323_v2 = vld [vmem:[%s727_s3] sm:$0xff] (!%p189_p2)  ;;  %v558_v3 = vpack.c.bf16 (!%p189_p2), %v231_v1, %v230_v0  ;;  %p217_p3 = scmp.lt.s32.totalorder (!%p189_p2), %s484_s24, 5  ;;  %v324_v4 = vld [vmem:[%s727_s3 + $0x8] sm:$0xff] (!%p189_p2)  ;;  %v326_v6 = vld [vmem:[%s727_s3 + $0x18] sm:$0xff] (!%p189_p2) }
   0x7   : > { %v562_v7 = vpack.c.bf16 (!%p189_p2), %v324_v4, %v323_v2  ;;  %v566_v8 = vpack.c.bf16 (!%p189_p2), %v326_v6, %v325_v5  ;;  %v327_v9 = vld [vmem:[%s727_s3 + $0x20] sm:$0xff] (!%p189_p2)  ;;  %v328_v10 = vld [vmem:[%s727_s3 + $0x28] sm:$0xff] (!%p189_p2)  ;;  %v329_v12 = vld [vmem:[%s727_s3 + $0x30] sm:$0xff] (!%p189_p2) }
   0x8   : > { %559 = vmatprep.subr.bf16.mxu0 (!%p189_p2), %v558_v3  ;;  %v570_v11 = vpack.c.bf16 (!%p189_p2), %v328_v10, %v327_v9  ;;  %v330_v15 = vld [vmem:[%s727_s3 + $0x38] sm:$0xff] (!%p189_p2)  ;;  %v331_v17 = vld [vmem:[%s727_s3 + $0x40] sm:$0xff] (!%p189_p2)  ;;  %v332_v18 = vld [vmem:[%s727_s3 + $0x48] sm:$0xff] (!%p189_p2) }
   0x9   : > { %561 = vmatpush3.bf16.msra.mxu0 (!%p189_p2), %v558_v3  ;;  %563 = vmatprep.subr.bf16.mxu1 (!%p189_p2), %v562_v7  ;;  %v574_v16 = vpack.c.bf16 (!%p189_p2), %v330_v15, %v329_v12  ;;  %v578_v19 = vpack.c.bf16 (!%p189_p2), %v332_v18, %v331_v17  ;;  %v333_v20 = vld [vmem:[%s727_s3 + $0x50] sm:$0xff] (!%p189_p2)  ;;  %v334_v21 = vld [vmem:[%s727_s3 + $0x58] sm:$0xff] (!%p189_p2)  ;;  %v335_v23 = vld [vmem:[%s727_s3 + $0x60] sm:$0xff] (!%p189_p2) }
   0xa   : > { %565 = vmatpush3.bf16.msra.mxu1 (!%p189_p2), %v562_v7  ;;  %v582_v22 = vpack.c.bf16 (!%p189_p2), %v334_v21, %v333_v20  ;;  %v336_v24 = vld [vmem:[%s727_s3 + $0x68] sm:$0xff] (!%p189_p2)  ;;  %v337_v26 = vld [vmem:[%s727_s3 + $0x70] sm:$0xff] (!%p189_p2)  ;;  %v338_v27 = vld [vmem:[%s727_s3 + $0x78] sm:$0xff] (!%p189_p2) }
   0xb   : > { %567 = vmatprep.subr.bf16.mxu1 (!%p189_p2), %v566_v8  ;;  %v586_v25 = vpack.c.bf16 (!%p189_p2), %v336_v24, %v335_v23  ;;  %v590_v28 = vpack.c.bf16 (!%p189_p2), %v338_v27, %v337_v26  ;;  %v488_v29 = vld [vmem:[%s726_s2] ss:$0 sm:$0xff] (!%p189_p2) }
   0xc   : > { %v491_v36 = vld [vmem:[%s728_s4] ss:$0 sm:$0xff] (!%p189_p2) }
   0xd   : > { %s731_s24 = smov (!%p217_p3, %s484_s24), 5 }
   0xe   : > { %s485_s12 = sshll.u32 %s731_s24, 3  ;;  %569 = vmatpush3.bf16.msra.mxu1 %v566_v8 }
   0xf   : > { %s220_s15 = scalar_lea.vmem %s724_s0, %s485_s12  ;;  %571 = vmatprep.subr.bf16.mxu1 %v570_v11  ;;  %s226_s21 = scalar_lea.vmem %s729_s5, %s485_s12 }
  0x10   : > { %v228_v13 = vld [vmem:[%s220_s15] sm:$0xff]  ;;  %v229_v14 = vld [vmem:[%s220_s15 + $0x8] sm:$0xff] }
  0x11   : > { %520 = vmatprep.mubr.msk.f32.mxu0 %vm239_vm0, %v228_v13 }
  0x12   : > { %521 = vmatmul.mubr.msk.f32.vlgmr.msra.gmra.mrb[0].mxu0 %vm239_vm0, %v229_v14  ;;  %573 = vmatpush3.bf16.msra.mxu1 %v570_v11 }
  0x13   : > { %575 = vmatprep.subr.bf16.mxu1 %v574_v16 }
  0x16   : > { %577 = vmatpush3.bf16.msra.mxu1 %v574_v16 }
  0x17   : > { %579 = vmatprep.subr.bf16.mxu1 %v578_v19 }
  0x1a   : > { %581 = vmatpush3.bf16.msra.mxu1 %v578_v19 }
  0x1b   : > { %583 = vmatprep.subr.bf16.mxu1 %v582_v22 }
  0x1e   : > { %585 = vmatpush3.bf16.msra.mxu1 %v582_v22 }
  0x1f   : > { %587 = vmatprep.subr.bf16.mxu1 %v586_v25 }
  0x22   : > { %589 = vmatpush3.bf16.msra.mxu1 %v586_v25 }
  0x23   : > { %591 = vmatprep.subr.bf16.mxu1 %v590_v28 }
  0x26   : > { %593 = vmatpush3.bf16.msra.mxu1 %v590_v28 }
  0xe5   : > { %v522_v30 = vpop.f32.mrb[0].mxu0 }
  0xe6   : > { %v318_v31 = vadd.f32 %v522_v30, %v488_v29  ;;  %v312_v32 = vpop.f32.mrb[1].mxu0 }
  0xe7   : > { %v313_v33 = vadd.f32 %v488_v29, %v312_v32 }
  0xe8   : > { %v322_v35 = vmax.f32 %v318_v31, 0.0 }
  0xe9   : > { %v321_v34 = vmax.f32 %v313_v33, 0.0 }
  0xeb   : > { %555 = vmatprep.mubr.f32.mxu1 %v321_v34 }
  0xec   : > { %556 = vmatmul.mubr.f32.vlgmr.msra.gmra.mrb[0].mxu1 %v322_v35 }
 0x1bf   : > { %v557_v37 = vpop.f32.mrb[0].mxu1 }
 0x1c0   : > { %v412_v38 = vpop.f32.mrb[1].mxu1  ;;  %v418_v40 = vadd.f32 %v557_v37, %v491_v36 }
 0x1c1   : > { %v413_v39 = vadd.f32 %v491_v36, %v412_v38 }
 0x1c2   : > { %422 = vst [vmem:[%s226_s21 + $0x8] sm:$0xff] %v418_v40 }
 0x1c3   : > { %421 = vst [vmem:[%s226_s21] sm:$0xff] %v413_v39 }
 0x1c4 PF: > { %s15_s18 = sadd.s32 1, %s608_s18  }
 0x1c5   : > { %p12_p4 = scmp.ge.s32.totalorder %s15_s18, 5  }
 0x1c7   :  { %14 = sbr.rel (!%p12_p4) target bundleno = 1 (0x1), region = 70 }

</bundles_post_ra>
